<compile_context>
chip_gen: v7x
topology: tpu7x:2x2x1
jax: 0.10.0
libtpu: 0.0.40
codegen_flags: <defaults>
</compile_context>

<pallas_src>
import jax
import jax.numpy as jnp
from jax.experimental import pallas as pl
from jax.experimental.pallas import tpu as pltpu


# ---------------------------------------------------------------------------
# Kernels
# ---------------------------------------------------------------------------
def _add_noise_kernel_4d(scale_ref, x_ref, noise_ref, o_ref):
    # scale_ref: (c_blk, 1, 1)     x_ref / o_ref: (1, c_blk, r_blk, L)
    # noise_ref: (1, 1, r_blk, L)
    s = scale_ref[...]                          # (c_blk, 1, 1)
    n = noise_ref[...]                          # (1, 1, r_blk, L)
    y = x_ref[...] + s[None, :, :, :] * n       # (1,c_blk,1,1) * (1,1,r,L)
    o_ref[...] = y.astype(o_ref.dtype)          # cast covers bf16 x / f32 scale


def _add_noise_kernel_3d(scale_ref, x_ref, noise_ref, o_ref):
    # Fallback layout (HW not a multiple of 128):
    # scale_ref: (C, 1)   x_ref/o_ref: (1, C, hw_blk)   noise_ref: (1, 1, hw_blk)
    s = scale_ref[...]
    n = noise_ref[...]
    y = x_ref[...] + s[None, :, :] * n
    o_ref[...] = y.astype(o_ref.dtype)


# ---------------------------------------------------------------------------
# Tiling heuristics
# ---------------------------------------------------------------------------
def _tpu_budget():
    """Return (target bytes per x tile, vmem_limit_bytes), generation-aware."""
    vmem = None
    try:
        info = pltpu.get_tpu_info()
        vmem = getattr(info, "vmem_capacity_bytes", None)
    except Exception:
        vmem = None
    if vmem is not None and vmem <= (64 << 20):
        # v7x-class: 3.2 TB/s HBM but only 64 MiB VMEM/core -> bigger tiles to
        # amortize the ~0.35us/step overhead; limit stays under physical VMEM.
        return 6 << 20, 48 << 20
    # v5e / v6e: 128 MiB physical VMEM, 0.8-1.4 TB/s HBM; 4 MiB tiles already
    # sit near the HBM roofline and 32 MiB comfortably covers double-buffering.
    return 4 << 20, 32 << 20


def _pick_tiles(C, R, L, itemsize, target_bytes):
    """Pick (c_blk, r_blk) so the x tile c_blk*r_blk*L*itemsize ~<= target."""
    row_bytes = L * itemsize
    rows_all_c = target_bytes // max(1, C * row_bytes)
    if rows_all_c >= 8 or R <= max(1, rows_all_c):
        # Full channel extent per tile (noise fetched once per spatial tile).
        c_blk = C
        r_blk = min(R, max(8, (rows_all_c // 8) * 8)) if R > 8 else R
    else:
        # C too large for full-channel tiles: add a channel-block axis instead
        # of shrinking the lane tile (128-lane tiles are ~3x off roofline).
        r_blk = min(R, 64)
        if r_blk < R:
            r_blk = max(8, (r_blk // 8) * 8)
        c_blk = max(1, min(C, target_bytes // max(1, r_blk * row_bytes)))
    return c_blk, r_blk


def _ensure_min_steps(other_steps, R, r_blk, min_steps=4):
    """Shrink r_blk (to a multiple of 8) so the grid has >= min_steps steps,
    letting both v7x TensorCores get work on single-batch inputs."""
    steps = other_steps * (-(-R // r_blk))
    if steps >= min_steps or R <= 8:
        return r_blk
    want_r_steps = -(-min_steps // max(1, other_steps))
    r_new = -(-R // want_r_steps)
    r_new = max(8, ((r_new + 7) // 8) * 8)
    return r_new if r_new < r_blk else r_blk


# ---------------------------------------------------------------------------
# Wrapper
# ---------------------------------------------------------------------------
def add_noise(x, noise, scale, *, donate_x=False):
    """x: (B, C, H, W); noise: (B, 1, H, W); scale: (C,). Returns x + scale*noise."""
    B, C, H, W = x.shape
    HW = H * W
    itemsize = jnp.dtype(x.dtype).itemsize
    target_bytes, vmem_limit = _tpu_budget()
    io_alias = {1: 0} if donate_x else {}   # x is operand 1 of (scale, x, noise)

    # Lane split: make the last two dims of every tile (rows, 128*k).
    L = None
    for cand in (512, 256, 128):
        if HW % cand == 0:
            L = cand
            break

    if L is not None:
        R = HW // L
        x2 = x.reshape(B, C, R, L)
        n2 = noise.reshape(B, 1, R, L)
        s2 = scale.reshape(C, 1, 1)

        c_blk, r_blk = _pick_tiles(C, R, L, itemsize, target_bytes)
        n_c_blocks = -(-C // c_blk)
        r_blk = _ensure_min_steps(B * n_c_blocks, R, r_blk)
        grid = (B, n_c_blocks, -(-R // r_blk))

        out = pl.pallas_call(
            _add_noise_kernel_4d,
            out_shape=jax.ShapeDtypeStruct((B, C, R, L), x.dtype),
            grid_spec=pl.GridSpec(
                grid=grid,
                in_specs=[
                    # per-channel scale, sliced per channel block
                    pl.BlockSpec((c_blk, 1, 1), lambda b, c, r: (c, 0, 0)),
                    # x tile: channel block x lane-dense (r_blk, L) slab
                    pl.BlockSpec((1, c_blk, r_blk, L),
                                 lambda b, c, r: (b, c, r, 0)),
                    # noise tile: shared across the channel axis
                    pl.BlockSpec((1, 1, r_blk, L),
                                 lambda b, c, r: (b, 0, r, 0)),
                ],
                out_specs=pl.BlockSpec((1, c_blk, r_blk, L),
                                       lambda b, c, r: (b, c, r, 0)),
            ),
            compiler_params=pltpu.CompilerParams(
                dimension_semantics=("parallel", "parallel", "parallel"),
                vmem_limit_bytes=vmem_limit,
            ),
            input_output_aliases=io_alias,
        )(s2, x2, n2)
        return out.reshape(B, C, H, W)

    # ---- Fallback: HW not a multiple of 128 (rare) — flat lane-dense layout.
    x2 = x.reshape(B, C, HW)
    n2 = noise.reshape(B, 1, HW)
    s2 = scale.reshape(C, 1)
    blk = (target_bytes // max(1, C * itemsize)) // 128 * 128
    hw_blk = min(HW, max(128, blk))          # never exceeds HW (clamp-order fix)
    grid = (B, -(-HW // hw_blk))

    out = pl.pallas_call(
        _add_noise_kernel_3d,
        out_shape=jax.ShapeDtypeStruct((B, C, HW), x.dtype),
        grid_spec=pl.GridSpec(
            grid=grid,
            in_specs=[
                pl.BlockSpec((C, 1), lambda b, h: (0, 0)),
                pl.BlockSpec((1, C, hw_blk), lambda b, h: (b, 0, h)),
                pl.BlockSpec((1, 1, hw_blk), lambda b, h: (b, 0, h)),
            ],
            out_specs=pl.BlockSpec((1, C, hw_blk), lambda b, h: (b, 0, h)),
        ),
        compiler_params=pltpu.CompilerParams(
            dimension_semantics=("parallel", "parallel"),
            vmem_limit_bytes=vmem_limit,
        ),
        input_output_aliases=io_alias,
    )(s2, x2, n2)
    return out.reshape(B, C, H, W)


# ---------------------------------------------------------------------------
# Module wrapper (mirrors AddNoise forward)
# ---------------------------------------------------------------------------
class AddNoiseJax:
    """Mirrors AddNoise(channels, fixed=False, per_channel=True) forward pass."""

    def __init__(self, channels, per_channel=True):
        scale_channels = channels if per_channel else 1
        # nn.init.constant_(self.scale_factors, 0)  -> deterministic zero init
        self.scale_factors = jnp.zeros((scale_channels,), dtype=jnp.float32)
        self.channels = channels
        self.per_channel = per_channel
        # TODO(synk): `fixed=True` noise caching is stateful RNG plumbing, handled
        # outside the kernel (noise is passed in explicitly here).

    def __call__(self, x, noise):
        B, C, H, W = x.shape
        scale = self.scale_factors
        if not self.per_channel:
            scale = jnp.broadcast_to(scale, (C,))
        return add_noise(x, noise, scale)


if __name__ == "__main__":
    key = jax.random.PRNGKey(0)
    kx, kn, ks, kx2, kn2 = jax.random.split(key, 5)

    # Shapes implied by the module: (B, C, H, W) x, (B, 1, H, W) noise map.
    B, C, H, W = 2, 4, 16, 16
    x = jax.random.normal(kx, (B, C, H, W), dtype=jnp.float32)
    noise = jax.random.normal(kn, (B, 1, H, W), dtype=jnp.float32)

    mod = AddNoiseJax(channels=C, per_channel=True)
    # Nonzero, per-channel-distinct scale so the broadcast path is exercised.
    mod.scale_factors = jax.random.normal(ks, (C,), dtype=jnp.float32)

    y = jax.block_until_ready(mod(x, noise))
    y_ref = x + mod.scale_factors.reshape(1, C, 1, 1) * noise
    assert y.shape == (B, C, H, W)
    assert jnp.allclose(y, y_ref, atol=1e-6), "mismatch vs reference (nonzero scale)"

    # Default zero-init path (matches nn.init.constant_(scale, 0)): y == x.
    mod0 = AddNoiseJax(channels=C, per_channel=True)
    y0 = jax.block_until_ready(mod0(x, noise))
    assert jnp.allclose(y0, x, atol=1e-6), "mismatch vs reference (zero scale)"

    # Second case: bf16 activations, multi-step grid with a ragged row tile
    # (R = 13 rows of 128 lanes, split into two r-blocks).
    B2, C2, H2, W2 = 1, 3, 13, 128
    x_b = jax.random.normal(kx2, (B2, C2, H2, W2), dtype=jnp.float32).astype(jnp.bfloat16)
    n_b = jax.random.normal(kn2, (B2, 1, H2, W2), dtype=jnp.float32)
    s_b = jnp.arange(1, C2 + 1, dtype=jnp.float32) * 0.1
    y_b = jax.block_until_ready(add_noise(x_b, n_b, s_b))
    y_b_ref = (x_b.astype(jnp.float32)
               + s_b.reshape(1, C2, 1, 1) * n_b).astype(jnp.bfloat16)
    assert jnp.allclose(y_b.astype(jnp.float32), y_b_ref.astype(jnp.float32),
                        atol=3e-2, rtol=3e-2), "mismatch vs reference (bf16/ragged)"

    print("KERNEL_OK")
</pallas_src>

<mosaic_0001>
module attributes {stable_mosaic.version = 11 : i64} {
  func.func @_add_noise_kernel_4d(%arg0: i32, %arg1: i32, %arg2: i32, %arg3: memref<4x1x1xf32, #tpu.memory_space<vmem>>, %arg4: memref<1x4x1x256xf32, #tpu.memory_space<vmem>>, %arg5: memref<1x1x1x256xf32, #tpu.memory_space<vmem>>, %arg6: memref<1x4x1x256xf32, #tpu.memory_space<vmem>>) attributes {dimension_semantics = [#tpu.dimension_semantics<parallel>, #tpu.dimension_semantics<parallel>, #tpu.dimension_semantics<parallel>], iteration_bounds = array<i64: 2, 1, 1>, scalar_prefetch = 0 : i64, scratch_operands = 0 : i64, tpu.core_type = #tpu.core_type<tc>, window_params = [{transform_indices = @transform_0, window_bounds = array<i64: 4, 1, 1>}, {transform_indices = @transform_1, window_bounds = array<i64: 1, 4, 1, 256>}, {transform_indices = @transform_2, window_bounds = array<i64: 1, 1, 1, 256>}, {transform_indices = @transform_3, window_bounds = array<i64: 1, 4, 1, 256>}]} {
    %c0 = arith.constant 0 : index
    %c0_0 = arith.constant 0 : index
    %c0_1 = arith.constant 0 : index
    %0 = vector.load %arg3[%c0, %c0_0, %c0_1] : memref<4x1x1xf32, #tpu.memory_space<vmem>>, vector<4x1x1xf32>
    %c0_2 = arith.constant 0 : index
    %c0_3 = arith.constant 0 : index
    %c0_4 = arith.constant 0 : index
    %c0_5 = arith.constant 0 : index
    %1 = vector.load %arg5[%c0_2, %c0_3, %c0_4, %c0_5] : memref<1x1x1x256xf32, #tpu.memory_space<vmem>>, vector<1x1x1x256xf32>
    %c0_6 = arith.constant 0 : index
    %c0_7 = arith.constant 0 : index
    %c0_8 = arith.constant 0 : index
    %c0_9 = arith.constant 0 : index
    %2 = vector.load %arg4[%c0_6, %c0_7, %c0_8, %c0_9] : memref<1x4x1x256xf32, #tpu.memory_space<vmem>>, vector<1x4x1x256xf32>
    %3 = vector.shape_cast %0 : vector<4x1x1xf32> to vector<1x4x1x1xf32>
    %4 = vector.broadcast %3 : vector<1x4x1x1xf32> to vector<1x4x1x256xf32>
    %5 = vector.broadcast %1 : vector<1x1x1x256xf32> to vector<1x4x1x256xf32>
    %6 = arith.mulf %4, %5 : vector<1x4x1x256xf32>
    %7 = arith.addf %2, %6 : vector<1x4x1x256xf32>
    %c0_10 = arith.constant 0 : index
    %c0_11 = arith.constant 0 : index
    %c0_12 = arith.constant 0 : index
    %c0_13 = arith.constant 0 : index
    %8 = vector.load %arg6[%c0_10, %c0_11, %c0_12, %c0_13] : memref<1x4x1x256xf32, #tpu.memory_space<vmem>>, vector<1x4x1x256xf32>
    tpu.vector_store %arg6[%c0_10, %c0_11, %c0_12, %c0_13], %7 {strides = array<i32>} : memref<1x4x1x256xf32, #tpu.memory_space<vmem>>, vector<1x4x1x256xf32>,
    return
  }
  func.func @transform_0(%arg0: i32, %arg1: i32, %arg2: i32) -> (i32, i32, i32) {
    %c0_i32 = arith.constant 0 : i32
    %c0_i32_0 = arith.constant 0 : i32
    %c0_i32_1 = arith.constant 0 : i32
    return %arg1, %c0_i32, %c0_i32_0 : i32, i32, i32
  }
  func.func @transform_1(%arg0: i32, %arg1: i32, %arg2: i32) -> (i32, i32, i32, i32) {
    %c0_i32 = arith.constant 0 : i32
    %c0_i32_0 = arith.constant 0 : i32
    return %arg0, %arg1, %arg2, %c0_i32 : i32, i32, i32, i32
  }
  func.func @transform_2(%arg0: i32, %arg1: i32, %arg2: i32) -> (i32, i32, i32, i32) {
    %c0_i32 = arith.constant 0 : i32
    %c0_i32_0 = arith.constant 0 : i32
    %c0_i32_1 = arith.constant 0 : i32
    return %arg0, %c0_i32, %arg2, %c0_i32_0 : i32, i32, i32, i32
  }
  func.func @transform_3(%arg0: i32, %arg1: i32, %arg2: i32) -> (i32, i32, i32, i32) {
    %c0_i32 = arith.constant 0 : i32
    %c0_i32_0 = arith.constant 0 : i32
    return %arg0, %arg1, %arg2, %c0_i32 : i32, i32, i32, i32
  }
}

</mosaic_0001>

<bundles_post_ra>
// kernel: tpu_custom_call.1
= control target key start
LH: loop header
LB: loop body
LE: loop exit
PB: predicated region body
PF: predicated region fallthrough
CT: control target
= control target key end

     0   :  { %8 = vsyncpa [#allocation3], 0  ;;  %s920_s0 = inlined_call_operand.vmem [shape: f32[4,1,1], index: 0, kind: input, shape index: {}]   ;;  %s921_s1 = inlined_call_operand.hbm [shape: f32[2,4,1,256], index: 1, kind: input, shape index: {}]   ;;  %s922_s2 = inlined_call_operand.vmem [shape: f32[2,1,1,256], index: 2, kind: input, shape index: {}]   ;;  %s923_s3 = inlined_call_operand.hbm [shape: f32[2,4,1,256], index: 3, kind: output, shape index: {}]  }
   0x1   :  { %10 = vsyncpa [#allocation3 + $0x1], 0 }
   0x2   :  { %11 = vsyncpa [#allocation4], 0 }
   0x3   :  { %13 = vsyncpa [#allocation4 + $0x1], 0  ;;  %s706_s12 = smov 0   ;;  %s708_s13 = smov 0  }
   0x4   :  { %s710_s14 = smov 0   ;;  %s712_s15 = smov 0  }
   0x5   :  { %s714_s16 = smov 0   ;;  %s716_s17 = smov 0  }
   0x6 LB: > { %s477_s18 = sadd.s32 4294967295, %s677_s17   ;;  %s478_s19 = sadd.s32 4294967294, %s677_s17   ;;  %s677_s17 = sphi %s716_s17, %s19_s17   ;;  %s673_s16 = sphi %s714_s16, %s940_s16   ;;  %s669_s15 = sphi %s712_s15, %s939_s15   ;;  %s665_s14 = sphi %s710_s14, %s938_s14   ;;  %s661_s13 = sphi %s708_s13, %s937_s13   ;;  %s657_s12 = sphi %s706_s12, %s936_s12  }
   0x7   : > { %s38_s20 = sadd.s32 1, %s673_s16  ;;  %s75_s21 = sadd.s32 1, %s665_s14 }
   0x8   : > { %p40_p0 = scmp.ge.s32.totalorder %s38_s20, 2  ;;  %p82_p1 = scmp.ne.s32.totalorder %s665_s14, %s661_s13 }
   0x9   : > { %p83_p2 = scmp.eq.s32.totalorder %s677_s17, 0  ;;  %p88_p3 = scmp.ne.s32.totalorder %s661_s13, %s657_s12 }
   0xa   : > { %s942_s20 = smov (%p40_p0, %s38_s20), 0  ;;  %p89_p5 = scmp.eq.s32.totalorder %s477_s18, 0 }
   0xb   : > { %p747_p4 = por %p83_p2, %p82_p1  ;;  %s68_s23 = ssub.s32 %s673_s16, %s942_s20 }
   0xc   : > { %p144_p6 = scmp.eq.s32.totalorder %s477_s18, 1  ;;  %p73_p7 = scmp.eq.s32.totalorder %s68_s23, 0 }
   0xd   : > { %p753_p8 = por %p89_p5, %p88_p3  ;;  %p150_p10 = scmp.eq.s32.totalorder %s478_s19, 1 }
   0xe   : > { %p757_p9 = por %p144_p6, %p82_p1  ;;  %p508_p13 = scmp.lt.s32.totalorder %s677_s17, 2 }
   0xf   : > { %s762_s26 = scalar_select %p73_p7, %s665_s14, %s75_s21  }
  0x10   : > { %s927_s25 = scalar_select %p757_p9, 1, 0 }
  0x11   : > { %p764_p11 = por %p150_p10, %p88_p3  ;;  %s178_s28 = sand.u32 1, %s665_s14  }
  0x12   : > { %s482_s29 = sshll.u32 %s178_s28, 3  ;;  %s494_s30 = sshll.u32 %s673_s16, 7 }
  0x13   : > { %s928_s27 = scalar_select %p764_p11, 1, 0 }
  0x14   : > { %s775_s6 = scalar_lea.hbm %s921_s1, %s494_s30  ;;  %s182_s7 = scalar_lea.vmem [#allocation2], %s482_s29 }
  0x15   : > { %s194_s8 = sshll.u32 %s182_s7, 4  ;;  %p781_p0 = pnand %p508_p13, %p747_p4  ;;  %s777_s8 = int_to_ptr.vmem [resolvable:$true] %s194_s8 }
  0x16   : > { %s786_s10 = scalar_lea.sflag [#allocation3], %s178_s28  ;;  %s565_s11 = scalar_lea.hbm %s775_s6, 128 }
  0x17   : > { %p566_p2 = scmp.ne.s32.totalorder %s775_s6, %s565_s11  ;;  %p567_p3 = pneg %p781_p0 }
  0x18   : > { %s570_s21 = scalar_lea.hbm %s921_s1, 256  ;;  %p571_p4 = scmp.lt.u32.totalorder %s775_s6, %s921_s1 }
  0x19   : > { %p568_p5 = pnand %p567_p3, %p566_p2  ;;  %p572_p7 = scmp.lt.u32.totalorder %s570_s21, %s565_s11 }
  0x1a   : > { %p574_p13 = scmp.lt.u32.totalorder %s565_s11, %s775_s6 }
  0x1b   : > { %p569_p6 = pneg %p568_p5  ;;  %p573_p10 = por %p572_p7, %p571_p4 }
  0x1d   : > { %p575_p12 = por %p574_p13, %p573_p10 }
  0x1f   : > { %p576_p1 = pnand %p575_p12, %p569_p6 }
  0x21   : > { %579 = shalt.err (!%p576_p1)
}
  0x22   : > { %s580_s28 = scalar_lea.vmem %s777_s8, 128  ;;  %s679_s29 = smov [#allocation2]  }
  0x23   : > { %p581_p2 = scmp.ne.s32.totalorder %s777_s8, %s580_s28  ;;  %s585_s30 = sshll.u32 %s679_s29, 4  ;;  %s586_s30 = int_to_ptr.vmem [resolvable:$false] %s585_s30 }
  0x24   : > { %s587_s4 = scalar_lea.vmem %s586_s30, 256  ;;  %p588_p9 = scmp.lt.s32.totalorder %s777_s8, %s586_s30 }
  0x25   : > { %p583_p5 = pnand %p581_p2, %p567_p3  ;;  %p589_p4 = scmp.lt.s32.totalorder %s587_s4, %s580_s28 }
  0x27   : > { %p584_p11 = pneg %p583_p5  ;;  %p590_p7 = por %p589_p4, %p588_p9 }
  0x29   : > { %p591_p10 = pnand %p590_p7, %p584_p11 }
  0x2b   : > { %594 = shalt.err (!%p591_p10)
}
  0x2c   : > { %s680_s5 = smov 32   ;;  %s681_s7 = smov 2  }
  0x2d   : > { %503 = dma.hbm_to_vmem [thread:$0]  (!%p781_p0), %s775_s6, 128, %s777_s8, %s786_s10, %s680_s5, %s680_s5, %s681_s7  }
  0x2e   : > { %p213_p12 = scmp.lt.s32.totalorder %s677_s17, 3  ;;  %p930_p1 = scmp.ge.s32.totalorder %s677_s17, 1 }
  0x30   : > { %p214_p3 = pnand %p930_p1, %p213_p12 }
  0x31   : > { %s818_s11 = sand.u32 (!%p214_p3), 1, %s661_s13  }
  0x32   : > { %217 = sbr.rel (%p214_p3) target bundleno = 213 (0xd5), region = 32  ;;  %s486_s18 = sshll.u32 (!%p214_p3), %s818_s11, 3 }
  0x33   : > { %s220_s19 = scalar_lea.sflag (!%p214_p3), [#allocation3], %s818_s11  ;;  %s824_s21 = scalar_lea.vmem (!%p214_p3), [#allocation2], %s486_s18 }
  0x39   : > { %648 = dma.done.wait (%p753_p8), %s220_s19, 128  }
  0x3a   : > { %650 = vsyncadd (%p753_p8), %s220_s19, 4294967168  ;;  %v682_v0 = vmov 0   ;;  %v275_v1 = vld [vmem:[%s920_s0 + $0x2] sm:$0x1]  ;;  %v273_v2 = vld [vmem:[%s920_s0] sm:$0x1]  ;;  %v287_v5 = vlaneseq }
  0x3b   : > { %564 = vset.pattern.permute.xlu1 %v682_v0  ;;  %563 = vset.pattern.permute.xlu0 %v682_v0  ;;  %v276_v3 = vld [vmem:[%s920_s0 + $0x3] sm:$0x1]  ;;  %v274_v4 = vld [vmem:[%s920_s0 + $0x1] sm:$0x1]  ;;  %p264_p8 = scmp.lt.s32.totalorder %s669_s15, 1  ;;  %s495_s19 = sshll.u32 %s669_s15, 7 }
  0x3c   : > { %302 = vperm.xlu1 %564, %v275_v1   ;;  %284 = vperm.xlu0 %563, %v273_v2   ;;  %v288_v6 = vshrl.u32 %v287_v5, 7  ;;  %v280_v13 = vld [vmem:[%s824_s21 + $0x4] sm:$0x3]  ;;  %v278_v14 = vld [vmem:[%s824_s21] sm:$0x3]  ;;  %vm849_vm0 = vcmp.lt.s32.totalorder %v287_v5, 256  ;;  %s865_s22 = scalar_lea.hbm %s923_s3, %s495_s19 }
  0x3d   : > { %s265_s29 = scalar_select %p264_p8, %s669_s15, 1  ;;  %v281_v24 = vld [vmem:[%s824_s21 + $0x6] sm:$0x3]  ;;  %v279_v25 = vld [vmem:[%s824_s21 + $0x2] sm:$0x3] }
  0x3e   : > { %v289_v7 = vsub.s32 0, %v288_v6  ;;  %s257_s6 = scalar_lea.vmem [#allocation5], %s486_s18  ;;  %s335_s15 = scalar_lea.sflag [#allocation4], %s818_s11 }
  0x3f   : > { %s488_s30 = sshll.u32 %s265_s29, 1  ;;  %s353_s8 = sshll.u32 %s257_s6, 4  ;;  %s867_s8 = int_to_ptr.vmem [resolvable:$true] %s353_s8 }
  0x40   : > { %311 = vperm.xlu1 %564, %v276_v3   ;;  %293 = vperm.xlu0 %563, %v274_v4   ;;  %s271_s7 = scalar_lea.vmem %s922_s2, %s488_s30  ;;  %s595_s18 = scalar_lea.vmem %s867_s8, 128 }
  0x41   : > { %v277_v8 = vld [vmem:[%s271_s7] sm:$0x3]  ;;  %p596_p9 = scmp.ne.s32.totalorder %s867_s8, %s595_s18  ;;  %p933_p11 = scmp.ne.s32.totalorder %s927_s25, 0 }
  0x42   : > { %s683_s21 = smov [#allocation5]  }
  0x43   : > { %p597_p0 = pnand %p596_p9, %p933_p11  ;;  %s599_s23 = sshll.u32 %s683_s21, 4  ;;  %s600_s23 = int_to_ptr.vmem [resolvable:$false] %s599_s23 }
  0x44   : > { %s601_s24 = scalar_lea.vmem %s600_s23, 256  ;;  %p602_p13 = scmp.lt.s32.totalorder %s867_s8, %s600_s23 }
  0x45   : > { %p598_p6 = pneg %p597_p0  ;;  %p603_p2 = scmp.lt.s32.totalorder %s601_s24, %s595_s18 }
  0x47   : > { %p604_p5 = por %p603_p2, %p602_p13 }
  0x49   : > { %p605_p4 = pnand %p604_p5, %p598_p6 }
  0xbb   : > { %v303_v9 = vpop.permute.xlu1 %302  ;;  %v285_v10 = vpop.permute.xlu0 %284 }
  0xbc   : > { %v308_v11 = vrot.slane %v303_v9, %v289_v7  ;;  %v290_v12 = vrot.slane %v285_v10, %v289_v7 }
  0xbe   : > { %v320_v15 = vmul.f32 %v308_v11, %v277_v8  ;;  %v318_v16 = vmul.f32 %v290_v12, %v277_v8 }
  0xbf   : > { %v312_v18 = vpop.permute.xlu1 %311  ;;  %v294_v19 = vpop.permute.xlu0 %293 }
  0xc0   : > { %v324_v20 = vadd.f32 %v320_v15, %v280_v13  ;;  %v322_v21 = vadd.f32 %v318_v16, %v278_v14  ;;  %v317_v22 = vrot.slane %v312_v18, %v289_v7  ;;  %v299_v23 = vrot.slane %v294_v19, %v289_v7 }
  0xc2   : > { %332 = vst.msk [vmem:[%s257_s6 + $0x4] sm:$0x3] %vm849_vm0, %v324_v20  ;;  %330 = vst.msk [vmem:[%s257_s6] sm:$0x3] %vm849_vm0, %v322_v21  ;;  %v321_v26 = vmul.f32 %v317_v22, %v277_v8  ;;  %v319_v27 = vmul.f32 %v299_v23, %v277_v8 }
  0xc4   : > { %v325_v28 = vadd.f32 %v321_v26, %v281_v24  ;;  %v323_v29 = vadd.f32 %v319_v27, %v279_v25 }
  0xc6   : > { %333 = vst.msk [vmem:[%s257_s6 + $0x6] sm:$0x3] %vm849_vm0, %v325_v28  ;;  %331 = vst.msk [vmem:[%s257_s6 + $0x2] sm:$0x3] %vm849_vm0, %v323_v29 }
  0xc7   : > { %608 = shalt.err (!%p605_p4)
}
  0xc8   : > { %s609_s28 = scalar_lea.hbm %s865_s22, 128  ;;  %s613_s4 = scalar_lea.hbm %s923_s3, 256 }
  0xc9   : > { %p610_p7 = scmp.ne.s32.totalorder %s865_s22, %s609_s28  ;;  %p614_p1 = scmp.lt.u32.totalorder %s865_s22, %s923_s3 }
  0xca   : > { %p615_p3 = scmp.lt.u32.totalorder %s613_s4, %s609_s28  ;;  %p617_p9 = scmp.lt.u32.totalorder %s609_s28, %s865_s22 }
  0xcb   : > { %p611_p10 = pnand %p610_p7, %p933_p11 }
  0xcc   : > { %p616_p8 = por %p615_p3, %p614_p1 }
  0xcd   : > { %p612_p12 = pneg %p611_p10 }
  0xce   : > { %p618_p0 = por %p617_p9, %p616_p8 }
  0xd0   : > { %p619_p6 = pnand %p618_p0, %p612_p12 }
  0xd2   : > { %622 = shalt.err (!%p619_p6)
}
  0xd3   : > { %s684_s19 = smov 32   ;;  %s685_s6 = smov 2  }
  0xd4   : > { %498 = dma.vmem_to_hbm [thread:$0]  (%p933_p11), %s867_s8, 128, %s865_s22, %s335_s15, %s684_s19, %s684_s19, %s685_s6  }
  0xd5 PF: > { %s368_s9 = sand.u32 1, %s657_s12   ;;  %p934_p13 = scmp.ne.s32.totalorder %s928_s27, 0 }
  0xd6   : > { %p935_p2 = scmp.ge.s32.totalorder %s677_s17, 2  ;;  %s369_s10 = scalar_lea.sflag [#allocation4], %s368_s9 }
  0xd8   : > { %p505_p5 = pnand %p935_p2, %p934_p13 }
  0xda   : > { %652 = dma.done.wait (!%p505_p5), %s369_s10, 128  }
  0xdb   : > { %654 = vsyncadd (!%p505_p5), %s369_s10, 4294967168  ;;  %s19_s17 = sadd.s32 1, %s677_s17   ;;  %s936_s12 = smov %s661_s13 }
  0xdc   : > { %p16_p4 = scmp.ge.s32.totalorder %s19_s17, 4   ;;  %s937_s13 = smov %s665_s14 }
  0xdd   : > { %s938_s14 = smov %s762_s26  ;;  %s939_s15 = smov %s673_s16 }
  0xde   : > { %s940_s16 = smov %s942_s20  ;;  %18 = sbr.rel (!%p16_p4) target bundleno = 6 (0x6), region = 83 }
  0xe5   :  { %374 = vsyncpa [#allocation3], 1 }
  0xe6   :  { %376 = vsyncpa [#allocation3 + $0x1], 1 }
  0xe7   :  { %377 = vsyncpa [#allocation4], 1 }
  0xe8   :  { %379 = vsyncpa [#allocation4 + $0x1], 1 }

</bundles_post_ra>
